<compile_context>
chip_gen: v6e
topology: v6e:2x2x1
jax: 0.10.0
libtpu: 0.0.40
codegen_flags: <defaults>
</compile_context>

<pallas_src>
import functools

import jax
import jax.numpy as jnp
from jax import lax
from jax.experimental import pallas as pl
from jax.experimental.pallas import tpu as pltpu


_MASK_VALUE = -10000.0            # matches the PyTorch module's `masked_bias`


@functools.lru_cache(maxsize=None)
def _vmem_limit_bytes():
    """Scoped-VMEM limit: 64 MiB on 128-MiB chips (v5e/v6e), ~3/4 of physical VMEM on
    smaller chips (v7x has only 64 MiB per TensorCore); conservative 48 MiB fallback."""
    try:
        phys = int(pltpu.get_tpu_info().vmem_capacity_bytes)
        return min(64 * 1024 * 1024, (phys * 3) // 4)
    except Exception:
        return 48 * 1024 * 1024


def _sublane_align(dtype):
    """Second-minor tile alignment for a dtype (8 for f32, 16 for bf16, 32 for int8)."""
    return max(8, 32 // jnp.dtype(dtype).itemsize)


def _pick_tile(dim, target, align):
    """Largest multiple of `align` that is <= target and divides `dim`; else full dim."""
    if dim <= target:
        return dim
    t = (target // align) * align
    while t >= align:
        if dim % t == 0:
            return t
        t -= align
    # TODO(synk): no aligned divisor <= target found; falls back to the full dimension
    # (correct but can be VMEM-heavy).  A remainder/masking path is not implemented.
    return dim


# ----------------------------------------------------------------------------
# Kernel 1: tiled Conv1D == linear layer with transposed weights: out = x @ W + b
# ----------------------------------------------------------------------------
def linear_kernel(x_ref, w_ref, b_ref, o_ref, acc_ref):
    k_idx = pl.program_id(2)

    @pl.when(k_idx == 0)
    def _init():
        acc_ref[...] = jnp.zeros(acc_ref.shape, acc_ref.dtype)

    # native-dtype operands (f32 or bf16), f32 accumulation on the MXU
    acc_ref[...] += jnp.dot(x_ref[...], w_ref[...],
                            preferred_element_type=jnp.float32)

    @pl.when(k_idx == pl.num_programs(2) - 1)
    def _finalize():
        o_ref[...] = (acc_ref[...] + b_ref[...]).astype(o_ref.dtype)


def conv1d(x2d, w, b, *, tm_target=512, tn_target=512, tk_target=512):
    """x2d: (M, K), w: (K, N), b: (N,) -> (M, N).  Tiled, pipelined matmul."""
    M, K = x2d.shape
    Kw, N = w.shape
    assert K == Kw
    tm = _pick_tile(M, tm_target, _sublane_align(x2d.dtype))
    tn = _pick_tile(N, tn_target, 128)
    tk = _pick_tile(K, tk_target, 128)
    grid = (M // tm, N // tn, K // tk)
    return pl.pallas_call(
        linear_kernel,
        out_shape=jax.ShapeDtypeStruct((M, N), x2d.dtype),
        grid=grid,
        in_specs=[
            pl.BlockSpec((tm, tk), lambda i, j, kk: (i, kk)),
            pl.BlockSpec((tk, tn), lambda i, j, kk: (kk, j)),
            pl.BlockSpec((1, tn), lambda i, j, kk: (0, j)),
        ],
        out_specs=pl.BlockSpec((tm, tn), lambda i, j, kk: (i, j)),
        scratch_shapes=[pltpu.VMEM((tm, tn), jnp.float32)],
        compiler_params=pltpu.CompilerParams(
            dimension_semantics=("parallel", "parallel", "arbitrary"),
            vmem_limit_bytes=_vmem_limit_bytes(),
        ),
    )(x2d, w, b.astype(jnp.float32).reshape(1, N))   # bias kept in f32


# ----------------------------------------------------------------------------
# Kernel 2: flash-style causal attention, heads split/merged inside the kernel
# ----------------------------------------------------------------------------
def _expand_head_cols(x_hn, hd):
    """(tq, H) -> (tq, H*hd): repeat each per-head column across that head's lanes."""
    tq, H = x_hn.shape
    return jnp.concatenate(
        [jnp.broadcast_to(x_hn[:, h:h + 1], (tq, hd)) for h in range(H)], axis=-1)


def flash_attn_kernel(q_ref, k_ref, v_ref, o_ref, acc_ref, m_ref, l_ref, *, n_head):
    qi = pl.program_id(1)
    ki = pl.program_id(2)
    tq = q_ref.shape[1]
    tkv = k_ref.shape[1]
    C = q_ref.shape[2]
    hd = C // n_head

    @pl.when(ki == 0)
    def _init():
        m_ref[...] = jnp.full(m_ref.shape, -jnp.inf, m_ref.dtype)
        l_ref[...] = jnp.zeros(l_ref.shape, l_ref.dtype)
        acc_ref[...] = jnp.zeros(acc_ref.shape, acc_ref.dtype)

    # Causal block skip: a block is fully masked when every key column lies strictly
    # to the right of the last query row of this tile.  Skipping it is numerically
    # identical (masked logits are -10000 -> exp underflows to 0) but saves all the
    # MXU / EUP / VPU work -- roughly half the (qi, ki) grid at large T.
    q_last_row = qi * tq + (tq - 1)
    k_first_col = ki * tkv

    @pl.when(q_last_row >= k_first_col)
    def _compute():
        q = q_ref[0]                                  # (tq, C), native dtype
        k = k_ref[0]                                  # (tkv, C)
        v = v_ref[0]                                  # (tkv, C)

        # Causal mask in global coordinates (nd == ns case of the PyTorch bias buffer),
        # shared across all heads of this (q-tile, kv-tile) pair.
        row = qi * tq + lax.broadcasted_iota(jnp.int32, (tq, tkv), 0)
        col = ki * tkv + lax.broadcasted_iota(jnp.int32, (tq, tkv), 1)
        causal = row >= col

        m_prev_all = m_ref[...]                       # (tq, H), read once per step
        pv_cols = []
        for h in range(n_head):                       # static unroll over heads
            hs = slice(h * hd, (h + 1) * hd)
            # q_h @ k_h^T via dot_general contracting the last dims (no explicit k.T);
            # note the 1/sqrt(hd) scale was folded into the c_attn weights already.
            s = lax.dot_general(q[:, hs], k[:, hs], (((1,), (1,)), ((), ())),
                                preferred_element_type=jnp.float32)   # (tq, tkv) f32
            s = jnp.where(causal, s, _MASK_VALUE)

            m_prev = m_prev_all[:, h:h + 1]                           # (tq, 1)
            m_new = jnp.maximum(m_prev, jnp.max(s, axis=-1, keepdims=True))
            alpha_h = jnp.exp(m_prev - m_new)
            p = jnp.exp(s - m_new)                                    # (tq, tkv) f32
            l_ref[:, h:h + 1] = alpha_h * l_ref[:, h:h + 1] + jnp.sum(
                p, axis=-1, keepdims=True)
            m_ref[:, h:h + 1] = m_new
            pv_cols.append(jnp.dot(p.astype(v.dtype), v[:, hs],
                                   preferred_element_type=jnp.float32))

        # Single full-width, lane-dense accumulator update (all heads at once) instead
        # of n_head lane-misaligned sub-slab read-modify-writes.
        alpha_all = jnp.exp(m_prev_all - m_ref[...])                  # (tq, H)
        acc_ref[...] = (_expand_head_cols(alpha_all, hd) * acc_ref[...]
                        + jnp.concatenate(pv_cols, axis=-1))

    @pl.when(ki == pl.num_programs(2) - 1)
    def _finalize():
        # Exact divide once per q tile (cheap; safer than approx reciprocal), followed
        # by a single lane-dense (tq, C) store with heads already merged.
        l_full = _expand_head_cols(l_ref[...], hd)                    # (tq, C)
        o_ref[0] = (acc_ref[...] / l_full).astype(o_ref.dtype)


def attn_core(q, k, v, *, n_head, q_block=256, kv_block=128):
    """q, k, v: (B, T, C) (heads NOT pre-split) -> (B, T, C) (heads merged)."""
    B, T, C = q.shape
    assert C % n_head == 0
    align = _sublane_align(q.dtype)
    tq = _pick_tile(T, q_block, align)
    tkv = _pick_tile(T, kv_block, align)
    kernel = functools.partial(flash_attn_kernel, n_head=n_head)
    q_spec = pl.BlockSpec((1, tq, C), lambda b, qi, ki: (b, qi, 0))
    kv_spec = pl.BlockSpec((1, tkv, C), lambda b, qi, ki: (b, ki, 0))
    return pl.pallas_call(
        kernel,
        out_shape=jax.ShapeDtypeStruct((B, T, C), q.dtype),
        grid=(B, T // tq, T // tkv),
        in_specs=[q_spec, kv_spec, kv_spec],
        out_specs=pl.BlockSpec((1, tq, C), lambda b, qi, ki: (b, qi, 0)),
        scratch_shapes=[
            pltpu.VMEM((tq, C), jnp.float32),        # merged-head f32 accumulator
            pltpu.VMEM((tq, n_head), jnp.float32),   # running row-max per head
            pltpu.VMEM((tq, n_head), jnp.float32),   # running denominator per head
        ],
        compiler_params=pltpu.CompilerParams(
            dimension_semantics=("parallel", "parallel", "arbitrary"),
            vmem_limit_bytes=_vmem_limit_bytes(),
        ),
    )(q, k, v)


# ----------------------------------------------------------------------------
# Full Attention module forward (self-attention, no layer_past, no extra masks,
# use_cache=False, output_attentions=False)
# ----------------------------------------------------------------------------
def init_attention_params(key, nx):
    k1, k2 = jax.random.split(key)
    return {
        "w_attn": 0.02 * jax.random.normal(k1, (nx, 3 * nx), jnp.float32),
        "b_attn": jnp.zeros((3 * nx,), jnp.float32),
        "w_proj": 0.02 * jax.random.normal(k2, (nx, nx), jnp.float32),
        "b_proj": jnp.zeros((nx,), jnp.float32),
    }


def attention_forward(hidden_states, params, *, n_head, scale=False,
                      attn_q_block=256, attn_kv_block=128, compute_dtype=None):
    B, T, C = hidden_states.shape
    assert C % n_head == 0
    hd = C // n_head
    in_dtype = hidden_states.dtype
    cd = compute_dtype if compute_dtype is not None else in_dtype

    w_attn = params["w_attn"].astype(jnp.float32)
    b_attn = params["b_attn"].astype(jnp.float32)
    if scale:
        # Fold 1/sqrt(head_dim) into the q-producing columns of c_attn so the attention
        # kernel never rescales q inside its kv loop (zero in-kernel cost).
        sfac = 1.0 / float(hd) ** 0.5
        col_scale = jnp.concatenate(
            [jnp.full((C,), sfac, jnp.float32), jnp.ones((2 * C,), jnp.float32)])
        w_attn = w_attn * col_scale
        b_attn = b_attn * col_scale

    x = hidden_states.astype(cd)

    # c_attn: (B*T, C) @ (C, 3C) + b   (tiled Pallas matmul)
    qkv = conv1d(x.reshape(B * T, C), w_attn.astype(cd), b_attn)
    qkv = qkv.reshape(B, T, 3 * C)
    # cheap column split only; head split/merge happens inside the attention kernel
    q, k, v = jnp.split(qkv, 3, axis=-1)

    a = attn_core(q, k, v, n_head=n_head,
                  q_block=attn_q_block, kv_block=attn_kv_block)   # (B, T, C)

    # c_proj
    out = conv1d(a.reshape(B * T, C), params["w_proj"].astype(cd), params["b_proj"])
    return out.reshape(B, T, C).astype(in_dtype)


# ----------------------------------------------------------------------------
# Pure-JAX reference (mirrors the PyTorch code path) for a correctness check
# ----------------------------------------------------------------------------
def attention_reference(hidden_states, params, *, n_head, scale=False):
    B, T, C = hidden_states.shape
    hd = C // n_head
    qkv = hidden_states.reshape(B * T, C) @ params["w_attn"] + params["b_attn"]
    q, k, v = jnp.split(qkv.reshape(B, T, 3 * C), 3, axis=-1)
    q = q.reshape(B, T, n_head, hd).transpose(0, 2, 1, 3)        # (B,H,T,hd)
    k = k.reshape(B, T, n_head, hd).transpose(0, 2, 3, 1)        # (B,H,hd,T)
    v = v.reshape(B, T, n_head, hd).transpose(0, 2, 1, 3)        # (B,H,T,hd)
    w = jnp.einsum("bhqd,bhdk->bhqk", q, k)
    if scale:
        w = w / (float(hd) ** 0.5)
    mask = jnp.tril(jnp.ones((T, T), bool))[None, None]
    w = jnp.where(mask, w, jnp.float32(_MASK_VALUE))
    w = jax.nn.softmax(w, axis=-1)
    a = jnp.einsum("bhqk,bhkd->bhqd", w, v)
    a = a.transpose(0, 2, 1, 3).reshape(B, T, C)
    return (a.reshape(B * T, C) @ params["w_proj"] + params["b_proj"]).reshape(B, T, C)


if __name__ == "__main__":
    # Small GPT-2-ish config: n_embd=32, n_head=4, seq=8, batch=2
    B, T, C, H = 2, 8, 32, 4
    key = jax.random.PRNGKey(0)
    pkey, xkey, x2key = jax.random.split(key, 3)

    params = init_attention_params(pkey, C)
    x = jax.random.normal(xkey, (B, T, C), jnp.float32)

    out = attention_forward(x, params, n_head=H, scale=True)
    out = jax.block_until_ready(out)
    ref = attention_reference(x, params, n_head=H, scale=True)
    assert out.shape == (B, T, C)
    assert jnp.allclose(out, ref, atol=5e-4, rtol=5e-4), "mismatch vs reference"

    # Exercise the multi-block online-softmax path + causal block skipping:
    # T=32 with 8x8 q/kv tiles (roughly half the (qi, ki) blocks are skipped).
    T2 = 32
    x2 = jax.random.normal(x2key, (B, T2, C), jnp.float32)
    out2 = attention_forward(x2, params, n_head=H, scale=True,
                             attn_q_block=8, attn_kv_block=8)
    out2 = jax.block_until_ready(out2)
    ref2 = attention_reference(x2, params, n_head=H, scale=True)
    assert jnp.allclose(out2, ref2, atol=5e-4, rtol=5e-4), "mismatch vs reference (flash path)"

    # bf16 activation/weight path (f32 accumulation inside the kernels), loose tolerance.
    out3 = attention_forward(x2, params, n_head=H, scale=True,
                             attn_q_block=16, attn_kv_block=16,
                             compute_dtype=jnp.bfloat16)
    out3 = jax.block_until_ready(out3)
    assert jnp.allclose(out3.astype(jnp.float32), ref2, atol=1e-2, rtol=1e-1), \
        "mismatch vs reference (bf16 path)"

    print("KERNEL_OK")
</pallas_src>

<mosaic_0001>
module attributes {stable_mosaic.version = 11 : i64} {
  func.func @linear_kernel(%arg0: i32, %arg1: i32, %arg2: i32, %arg3: memref<16x32xf32, #tpu.memory_space<vmem>>, %arg4: memref<32x96xf32, #tpu.memory_space<vmem>>, %arg5: memref<1x96xf32, #tpu.memory_space<vmem>>, %arg6: memref<16x96xf32, #tpu.memory_space<vmem>>, %arg7: memref<16x96xf32, #tpu.memory_space<vmem>>) attributes {dimension_semantics = [#tpu.dimension_semantics<parallel>, #tpu.dimension_semantics<parallel>, #tpu.dimension_semantics<arbitrary>], iteration_bounds = array<i64: 1, 1, 1>, scalar_prefetch = 0 : i64, scratch_operands = 1 : i64, tpu.core_type = #tpu.core_type<tc>, window_params = [{transform_indices = @transform_0, window_bounds = array<i64: 16, 32>}, {transform_indices = @transform_1, window_bounds = array<i64: 32, 96>}, {transform_indices = @transform_2, window_bounds = array<i64: 1, 96>}, {transform_indices = @transform_3, window_bounds = array<i64: 16, 96>}]} {
    %c0_i32 = arith.constant 0 : i32
    %0 = arith.cmpi eq, %arg2, %c0_i32 : i32
    %1 = arith.extui %0 : i1 to i32
    %c0_i32_0 = arith.constant 0 : i32
    %2 = arith.cmpi ne, %1, %c0_i32_0 : i32
    scf.if %2 {
      %cst_10 = arith.constant 0.000000e+00 : f32
      %12 = vector.broadcast %cst_10 : f32 to vector<16x96xf32>
      %c0_11 = arith.constant 0 : index
      %c0_12 = arith.constant 0 : index
      %13 = vector.load %arg7[%c0_11, %c0_12] : memref<16x96xf32, #tpu.memory_space<vmem>>, vector<16x96xf32>
      tpu.vector_store %arg7[%c0_11, %c0_12], %12 {strides = array<i32>} : memref<16x96xf32, #tpu.memory_space<vmem>>, vector<16x96xf32>,
    } else {
    }
    %c0 = arith.constant 0 : index
    %c0_1 = arith.constant 0 : index
    %3 = vector.load %arg7[%c0, %c0_1] : memref<16x96xf32, #tpu.memory_space<vmem>>, vector<16x96xf32>
    %c0_2 = arith.constant 0 : index
    %c0_3 = arith.constant 0 : index
    %4 = vector.load %arg3[%c0_2, %c0_3] : memref<16x32xf32, #tpu.memory_space<vmem>>, vector<16x32xf32>
    %c0_4 = arith.constant 0 : index
    %c0_5 = arith.constant 0 : index
    %5 = vector.load %arg4[%c0_4, %c0_5] : memref<32x96xf32, #tpu.memory_space<vmem>>, vector<32x96xf32>
    %cst = arith.constant dense<0.000000e+00> : vector<16x96xf32>
    %6 = tpu.matmul %4, %5, %cst {dimension_numbers = #tpu.dot_dimension_numbers<[1], [0], [0], [1], [0, 0, 1, 1], [], []>} : vector<16x32xf32>, vector<32x96xf32>, vector<16x96xf32> -> vector<16x96xf32>
    %7 = arith.addf %3, %6 : vector<16x96xf32>
    %c0_6 = arith.constant 0 : index
    %c0_7 = arith.constant 0 : index
    %8 = vector.load %arg7[%c0_6, %c0_7] : memref<16x96xf32, #tpu.memory_space<vmem>>, vector<16x96xf32>
    tpu.vector_store %arg7[%c0_6, %c0_7], %7 {strides = array<i32>} : memref<16x96xf32, #tpu.memory_space<vmem>>, vector<16x96xf32>,
    %c0_i32_8 = arith.constant 0 : i32
    %9 = arith.cmpi eq, %arg2, %c0_i32_8 : i32
    %10 = arith.extui %9 : i1 to i32
    %c0_i32_9 = arith.constant 0 : i32
    %11 = arith.cmpi ne, %10, %c0_i32_9 : i32
    scf.if %11 {
      %c0_10 = arith.constant 0 : index
      %c0_11 = arith.constant 0 : index
      %12 = vector.load %arg7[%c0_10, %c0_11] : memref<16x96xf32, #tpu.memory_space<vmem>>, vector<16x96xf32>
      %c0_12 = arith.constant 0 : index
      %c0_13 = arith.constant 0 : index
      %13 = vector.load %arg5[%c0_12, %c0_13] : memref<1x96xf32, #tpu.memory_space<vmem>>, vector<1x96xf32>
      %14 = vector.broadcast %13 : vector<1x96xf32> to vector<16x96xf32>
      %15 = arith.addf %12, %14 : vector<16x96xf32>
      %c0_14 = arith.constant 0 : index
      %c0_15 = arith.constant 0 : index
      %16 = vector.load %arg6[%c0_14, %c0_15] : memref<16x96xf32, #tpu.memory_space<vmem>>, vector<16x96xf32>
      tpu.vector_store %arg6[%c0_14, %c0_15], %15 {strides = array<i32>} : memref<16x96xf32, #tpu.memory_space<vmem>>, vector<16x96xf32>,
    } else {
    }
    return
  }
  func.func @transform_0(%arg0: i32, %arg1: i32, %arg2: i32) -> (i32, i32) {
    %c0_i32 = arith.constant 0 : i32
    return %arg0, %arg2 : i32, i32
  }
  func.func @transform_1(%arg0: i32, %arg1: i32, %arg2: i32) -> (i32, i32) {
    %c0_i32 = arith.constant 0 : i32
    return %arg2, %arg1 : i32, i32
  }
  func.func @transform_2(%arg0: i32, %arg1: i32, %arg2: i32) -> (i32, i32) {
    %c0_i32 = arith.constant 0 : i32
    %c0_i32_0 = arith.constant 0 : i32
    return %c0_i32, %arg1 : i32, i32
  }
  func.func @transform_3(%arg0: i32, %arg1: i32, %arg2: i32) -> (i32, i32) {
    %c0_i32 = arith.constant 0 : i32
    return %arg0, %arg1 : i32, i32
  }
}

</mosaic_0001>

<bundles_post_ra>
// kernel: tpu_custom_call.1
= control target key start
LH: loop header
LB: loop body
LE: loop exit
PB: predicated region body
PF: predicated region fallthrough
CT: control target
= control target key end

     0   :  { %8 = vsyncpa [#allocation4], 0  ;;  %s326_s0 = inlined_call_operand.hbm [shape: f32[16,32], index: 0, kind: input, shape index: {}]   ;;  %s327_s1 = inlined_call_operand.hbm [shape: f32[32,96], index: 1, kind: input, shape index: {}]   ;;  %s328_s2 = inlined_call_operand.vmem [shape: f32[1,96], index: 2, kind: input, shape index: {}]   ;;  %s329_s3 = inlined_call_operand.hbm [shape: f32[16,96], index: 3, kind: output, shape index: {}]  }
   0x1   :  { %9 = vsyncpa [#allocation7], 0 }
   0x2   :  { %10 = vsyncpa [#allocation5], 0  ;;  %s271_s12 = smov [#allocation3]  }
   0x3   :  { %s16_s13 = sshll.u32 %s271_s12, 4  ;;  %s17_s13 = int_to_ptr.vmem [resolvable:$true] %s16_s13 }
   0x4   :  { %s213_s14 = scalar_lea.vmem %s17_s13, 256  ;;  %p218_p1 = scmp.lt.s32.totalorder %s17_s13, %s17_s13 }
   0x5   :  { %p214_p0 = scmp.ne.s32.totalorder %s17_s13, %s213_s14  ;;  %p219_p2 = scmp.lt.s32.totalorder %s213_s14, %s213_s14 }
   0x7   :  { %p220_p3 = por %p219_p2, %p218_p1 }
   0x9   :  { %p221_p4 = pnand %p220_p3, %p214_p0 }
   0xb   :  { %224 = shalt.err (!%p221_p4)
}
   0xc   :  { %s272_s15 = smov 128   ;;  %s273_s16 = smov 8  }
   0xd   :  { %22 = dma.hbm_to_vmem [thread:$0]  %s326_s0, 256, %s17_s13, [#allocation4], %s272_s15, %s272_s15, %s273_s16  }
   0xe   :  { %s274_s19 = smov [#allocation6]  }
   0xf   :  { %s28_s20 = sshll.u32 %s274_s19, 4  ;;  %s29_s20 = int_to_ptr.vmem [resolvable:$true] %s28_s20 }
  0x10   :  { %s233_s21 = scalar_lea.vmem %s29_s20, 512  ;;  %p238_p6 = scmp.lt.s32.totalorder %s29_s20, %s29_s20 }
  0x11   :  { %p234_p5 = scmp.ne.s32.totalorder %s29_s20, %s233_s21  ;;  %p239_p7 = scmp.lt.s32.totalorder %s233_s21, %s233_s21 }
  0x13   :  { %p240_p8 = por %p239_p7, %p238_p6 }
  0x15   :  { %p241_p9 = pnand %p240_p8, %p234_p5 }
  0x17   :  { %244 = shalt.err (!%p241_p9)
}
  0x18   :  { %34 = dma.hbm_to_vmem [thread:$0]  %s327_s1, 512, %s29_s20, [#allocation7], %s272_s15, %s272_s15, %s273_s16  }
  0x19   :  { %265 = dma.done.wait [#allocation4], 256  }
  0x1a   :  { %266 = vsyncadd [#allocation4], 4294967040 }
  0x1b   :  { %267 = dma.done.wait [#allocation7], 512  }
  0x1c   :  { %268 = vsyncadd [#allocation7], 4294966784  ;;  %vm47_vm0 = vcmask 785408   ;;  %v275_v0 = vmov 0.0   ;;  %vm58_vm1 = vcmask 261120   ;;  %v57_v1 = vld [vmem:[#allocation6 + $0x18] sm:$0xff] }
  0x1d   :  { %49 = vst.msk [vmem:[#allocation2 + $0x8] sm:$0xff] %vm47_vm0, %v275_v0  ;;  %48 = vst.msk [vmem:[#allocation2] sm:$0xff] %vm47_vm0, %v275_v0  ;;  %v56_v2 = vld [vmem:[#allocation6 + $0x10] sm:$0xff]  ;;  %188 = vmatprep.subr.mxu0 %v57_v1  ;;  %v55_v4 = vld [vmem:[#allocation6 + $0x8] sm:$0xff]  ;;  %s276_s24 = smov [#allocation8]  }
  0x1e   :  { %v52_v3 = vld [vmem:[#allocation3] sm:$0xff]  ;;  %189 = vmatpush3.msra.mxu0 %v57_v1  ;;  %v54_v5 = vld [vmem:[#allocation6] sm:$0xff]  ;;  %v53_v6 = vld [vmem:[#allocation3 + $0x8] sm:$0xff]  ;;  %s166_s25 = sshll.u32 %s276_s24, 4  ;;  %s167_s25 = int_to_ptr.vmem [resolvable:$true] %s166_s25 }
  0x1f   :  { %196 = vmatprep.mubr.msk.f32.mxu0 %vm58_vm1, %v52_v3  ;;  %190 = vmatprep.subr.mxu0 %v56_v2  ;;  %v181_v13 = vld [vmem:[%s328_s2] ss:$0 sm:$0xff]  ;;  %s245_s26 = scalar_lea.vmem %s167_s25, 256  ;;  %p250_p11 = scmp.lt.s32.totalorder %s167_s25, %s167_s25 }
  0x20   :  { %191 = vmatpush3.msra.mxu0 %v56_v2  ;;  %p246_p10 = scmp.ne.s32.totalorder %s167_s25, %s245_s26  ;;  %p251_p12 = scmp.lt.s32.totalorder %s245_s26, %s245_s26 }
  0x21   :  { %192 = vmatprep.subr.mxu0 %v55_v4 }
  0x22   :  { %193 = vmatpush3.msra.mxu0 %v55_v4  ;;  %p252_p13 = por %p251_p12, %p250_p11 }
  0x23   :  { %194 = vmatprep.subr.mxu0 %v54_v5 }
  0x24   :  { %195 = vmatpush3.msra.mxu0 %v54_v5  ;;  %v51_v7 = vld [vmem:[#allocation2 + $0x8] sm:$0xff]  ;;  %v50_v9 = vld [vmem:[#allocation2] sm:$0xff]  ;;  %p253_p0 = pnand %p252_p13, %p246_p10 }
  0x25   :  { %197 = vmatmul.mubr.msk.f32.vlgmr.msra.gmra.mxu0 %vm58_vm1, %v53_v6 }
  0xe5   :  { %v198_v8 = vpop.f32.mrf.mxu0 }
  0xe6   :  { %v141_v10 = vadd.f32 %v198_v8, %v51_v7 }
  0xe7   :  { %v131_v11 = vpop.f32.mrf.mxu0 }
  0xe8   :  { %144 = vst.msk [vmem:[#allocation2 + $0x8] sm:$0xff] %vm47_vm0, %v141_v10  ;;  %v140_v12 = vadd.f32 %v131_v11, %v50_v9 }
  0xea   :  { %143 = vst.msk [vmem:[#allocation2] sm:$0xff] %vm47_vm0, %v140_v12 }
  0xef   :  { %v149_v14 = vld [vmem:[#allocation2 + $0x8] sm:$0xff] }
  0xf0   :  { %v158_v15 = vadd.f32 %v181_v13, %v149_v14 }
  0xf1   :  { %v148_v16 = vld [vmem:[#allocation2] sm:$0xff] }
  0xf2   :  { %v157_v17 = vadd.f32 %v181_v13, %v148_v16  ;;  %160 = vst.msk [vmem:[#allocation8 + $0x8] sm:$0xff] %vm47_vm0, %v158_v15 }
  0xf4   :  { %159 = vst.msk [vmem:[#allocation8] sm:$0xff] %vm47_vm0, %v157_v17 }
  0xf5   :  { %256 = shalt.err (!%p253_p0)
}
  0xf6   :  { %172 = dma.vmem_to_hbm [thread:$0]  %s167_s25, 256, %s329_s3, [#allocation5], %s272_s15, %s272_s15, %s273_s16  }
  0xf7   :  { %269 = dma.done.wait [#allocation5], 256  }
  0xf8   :  { %270 = vsyncadd [#allocation5], 4294967040 }
  0xf9   :  { %176 = vsyncpa [#allocation4], 1 }
  0xfa   :  { %177 = vsyncpa [#allocation7], 1 }
  0xfb   :  { %178 = vsyncpa [#allocation5], 1 }

</bundles_post_ra>
